<compile_context>
chip_gen: v6e
topology: v6e:2x2x1
jax: 0.10.0
libtpu: 0.0.40
codegen_flags: <defaults>
</compile_context>

<pallas_src>
import jax
import jax.numpy as jnp
from jax.experimental import pallas as pl
from jax.experimental.pallas import tpu as pltpu


def _cdiv(a: int, b: int) -> int:
    return (a + b - 1) // b


def _round_up(x: int, m: int) -> int:
    return _cdiv(x, m) * m


def latent_dense_decoder_kernel(x_ref, w_ref, b_ref, o_ref):
    # BN affine is pre-folded into w_ref / b_ref, so the body is just matmul + bias.
    # Cast x to the matmul dtype in-kernel (cheap VPU work hidden under the MXU).
    x = x_ref[...].astype(w_ref.dtype)
    acc = jnp.dot(x, w_ref[...], preferred_element_type=jnp.float32)
    o_ref[...] = (acc + b_ref[...]).astype(o_ref.dtype)


def fold_bn_into_linear(gamma, beta, running_mean, running_var, weight, bias,
                        *, eps=1e-5, compute_dtype=jnp.bfloat16):
    """Fold eval-mode BatchNorm1d into the following Linear layer.

    Call once (e.g. at checkpoint-load time) and reuse the results:
        BN(x) @ weight.T + bias  ==  x @ w_io + b_row

    Returns:
      w_io : (in_width, out_width) in `compute_dtype` (scale folded in; f32 math first)
      b_row: (1, out_width) float32
    """
    inv_std = jax.lax.rsqrt(running_var.astype(jnp.float32) + eps)
    scale = gamma.astype(jnp.float32) * inv_std                              # (in,)
    shift = beta.astype(jnp.float32) - running_mean.astype(jnp.float32) * scale
    w_t = weight.astype(jnp.float32).T                                       # (in, out)
    w_io = (scale[:, None] * w_t).astype(compute_dtype)
    b_row = (bias.astype(jnp.float32) + shift @ w_t)[None, :]                # (1, out)
    return w_io, b_row


def _pick_vmem_limit(est_bytes: int) -> int:
    try:
        cap = int(pltpu.get_tpu_info().vmem_capacity_bytes)
    except Exception:
        cap = 64 * 1024 * 1024          # conservative: v7x per-TensorCore VMEM
    want = max(32 * 1024 * 1024, int(est_bytes) + (8 << 20))
    return int(min(want, int(cap * 0.85)))


def latent_dense_decoder_fused(x, w_io, b_row, *, tm_max=1024, tn_max=2048,
                               vmem_limit_bytes=None):
    """o = x @ w_io + b_row  (BN already folded into w_io / b_row).

    x    : (B, in_width)            any float dtype; cast to w_io.dtype in-kernel
    w_io : (in_width, out_width)    matmul dtype (bf16 recommended on v6e/v7x)
    b_row: (1, out_width) float32
    Output: (B, out_width) in x.dtype.
    """
    B, in_width = x.shape
    kw_, out_width = w_io.shape
    assert kw_ == in_width, (w_io.shape, x.shape)
    b_row = jnp.asarray(b_row, jnp.float32).reshape(1, out_width)

    # ---- batch tiling: cdiv split keeps padding under 8 rows per tile -------------
    grid_m = max(1, _cdiv(B, tm_max))
    if grid_m == 1:
        tm, b_pad = B, B                       # full-dim block: no alignment needed
    else:
        tm = _round_up(_cdiv(B, grid_m), 8)
        b_pad = grid_m * tm

    # ---- output tiling: one lane-dense block unless out_width is large -----------
    # Keep a (double-buffered) weight tile within ~8 MiB so it fits v5e's 16 MiB
    # default scoped VMEM and leaves headroom on v7x's 64 MiB.
    itemsize = jnp.dtype(w_io.dtype).itemsize
    tn_budget = max(128, ((8 << 20) // max(2 * in_width * itemsize, 1)) // 128 * 128)
    tn_cap = min(tn_max, tn_budget)
    if out_width > tn_cap:
        grid_n = _cdiv(out_width, tn_cap)
        tn = _round_up(_cdiv(out_width, grid_n), 128)
        out_pad = grid_n * tn
    else:
        grid_n, tn, out_pad = 1, out_width, out_width

    # ---- pad only when the tiling actually requires it (no gratuitous copies) ----
    x_in = x if b_pad == B else jnp.zeros((b_pad, in_width), x.dtype).at[:B].set(x)
    if out_pad == out_width:
        w_in, b_in = w_io, b_row
    else:
        w_in = jnp.zeros((in_width, out_pad), w_io.dtype).at[:, :out_width].set(w_io)
        b_in = jnp.zeros((1, out_pad), jnp.float32).at[:, :out_width].set(b_row)

    if vmem_limit_bytes is None:
        est = 2 * (tm * in_width * x.dtype.itemsize        # x tile (double-buffered)
                   + tm * tn * x.dtype.itemsize            # o tile (double-buffered)
                   + in_width * tn * itemsize              # weight tile
                   + tn * 4)                               # bias tile
        vmem_limit_bytes = _pick_vmem_limit(est)

    out = pl.pallas_call(
        latent_dense_decoder_kernel,
        out_shape=jax.ShapeDtypeStruct((b_pad, out_pad), x.dtype),
        grid=(grid_m, grid_n),
        in_specs=[
            pl.BlockSpec((tm, in_width), lambda i, j: (i, 0)),   # x  : batch-tiled
            pl.BlockSpec((in_width, tn), lambda i, j: (0, j)),   # W' : N-tiled / resident
            pl.BlockSpec((1, tn), lambda i, j: (0, j)),          # b' : N-tiled / resident
        ],
        out_specs=pl.BlockSpec((tm, tn), lambda i, j: (i, j)),
        compiler_params=pltpu.CompilerParams(
            dimension_semantics=("parallel", "parallel"),
            vmem_limit_bytes=int(vmem_limit_bytes)),
    )(x_in, w_in, b_in)

    if b_pad != B or out_pad != out_width:
        out = out[:B, :out_width]
    return out


def latent_dense_decoder(x, gamma, beta, running_mean, running_var, weight, bias,
                         *, eps=1e-5, compute_dtype=jnp.bfloat16, tm_max=1024,
                         tn_max=2048):
    """One-shot wrapper matching LatentDenseDecoder.forward (eval mode).

    For repeated calls, fold once with fold_bn_into_linear() and call
    latent_dense_decoder_fused() directly (the fold is a full pass over the weight).
    """
    w_io, b_row = fold_bn_into_linear(gamma, beta, running_mean, running_var,
                                      weight, bias, eps=eps,
                                      compute_dtype=compute_dtype)
    return latent_dense_decoder_fused(x, w_io, b_row, tm_max=tm_max, tn_max=tn_max)


def latent_dense_decoder_ref(x, gamma, beta, mean, var, weight, bias, eps=1e-5):
    xn = (x - mean) * jax.lax.rsqrt(var + eps) * gamma + beta
    return xn @ weight.T + bias


if __name__ == "__main__":
    key = jax.random.PRNGKey(0)

    def make_params(k, in_w, out_w):
        kg, kb, km, kv, kw, kbi = jax.random.split(k, 6)
        gamma = 1.0 + 0.1 * jax.random.normal(kg, (in_w,), jnp.float32)
        beta = 0.1 * jax.random.normal(kb, (in_w,), jnp.float32)
        mean = 0.1 * jax.random.normal(km, (in_w,), jnp.float32)
        var = jax.random.uniform(kv, (in_w,), jnp.float32, 0.5, 1.5)
        bound = 1.0 / (in_w ** 0.5)          # nn.Linear default init bound
        weight = jax.random.uniform(kw, (out_w, in_w), jnp.float32, -bound, bound)
        bias = jax.random.uniform(kbi, (out_w,), jnp.float32, -bound, bound)
        return gamma, beta, mean, var, weight, bias

    k1, k2, k3, k4 = jax.random.split(key, 4)

    # --- case 1: LatentDenseDecoder(32, 16), batch 16 — tiny, no padding at all ----
    batch, in_width, out_width = 16, 32, 16
    gamma, beta, mean, var, weight, bias = make_params(k1, in_width, out_width)
    x = jax.random.normal(k2, (batch, in_width), jnp.float32)
    ref = latent_dense_decoder_ref(x, gamma, beta, mean, var, weight, bias)

    # f32 matmul path (near-exact check of the BN fold).
    w32, b32 = fold_bn_into_linear(gamma, beta, mean, var, weight, bias,
                                   compute_dtype=jnp.float32)
    out_f32 = jax.block_until_ready(latent_dense_decoder_fused(x, w32, b32))
    assert out_f32.shape == (batch, out_width) and out_f32.dtype == x.dtype
    assert jnp.allclose(out_f32, ref, atol=1e-4, rtol=1e-4)

    # bf16 matmul-operand path (default); fold once, reuse below.
    wbf, bbf = fold_bn_into_linear(gamma, beta, mean, var, weight, bias)
    out_bf = jax.block_until_ready(latent_dense_decoder_fused(x, wbf, bbf))
    assert jnp.allclose(out_bf, ref, atol=5e-2, rtol=5e-2)

    # Convenience wrapper (same signature as the nn.Module forward in eval mode).
    out_conv = jax.block_until_ready(
        latent_dense_decoder(x, gamma, beta, mean, var, weight, bias))
    assert jnp.allclose(out_conv, ref, atol=5e-2, rtol=5e-2)

    # --- case 2: batch grid + <8-row batch padding (grid_m=4, tm=256, pads 24 rows) -
    big_B = 1000
    xb = jax.random.normal(k3, (big_B, in_width), jnp.float32)
    out_big = jax.block_until_ready(
        latent_dense_decoder_fused(xb, wbf, bbf, tm_max=256))
    ref_big = latent_dense_decoder_ref(xb, gamma, beta, mean, var, weight, bias)
    assert out_big.shape == (big_B, out_width)
    assert jnp.allclose(out_big, ref_big, atol=5e-2, rtol=5e-2)

    # --- case 3: N-tiled output (grid_n=2, tn=128, out_width 200 padded to 256) -----
    in2, out2, B2 = 64, 200, 64
    g2, be2, m2, v2, w2, bi2 = make_params(k4, in2, out2)
    x2 = jax.random.normal(k2, (B2, in2), jnp.float32)
    wio2, brow2 = fold_bn_into_linear(g2, be2, m2, v2, w2, bi2)
    out2_k = jax.block_until_ready(
        latent_dense_decoder_fused(x2, wio2, brow2, tm_max=32, tn_max=128))
    ref2 = latent_dense_decoder_ref(x2, g2, be2, m2, v2, w2, bi2)
    assert out2_k.shape == (B2, out2)
    assert jnp.allclose(out2_k, ref2, atol=5e-2, rtol=5e-2)

    print("KERNEL_OK")
</pallas_src>

<mosaic_0001>
module attributes {stable_mosaic.version = 11 : i64} {
  func.func @latent_dense_decoder_kernel(%arg0: i32, %arg1: i32, %arg2: memref<16x32xf32, #tpu.memory_space<vmem>>, %arg3: memref<32x16xf32, #tpu.memory_space<vmem>>, %arg4: memref<1x16xf32, #tpu.memory_space<vmem>>, %arg5: memref<16x16xf32, #tpu.memory_space<vmem>>) attributes {dimension_semantics = [#tpu.dimension_semantics<parallel>, #tpu.dimension_semantics<parallel>], iteration_bounds = array<i64: 1, 1>, scalar_prefetch = 0 : i64, scratch_operands = 0 : i64, tpu.core_type = #tpu.core_type<tc>, window_params = [{transform_indices = @transform_0, window_bounds = array<i64: 16, 32>}, {transform_indices = @transform_1, window_bounds = array<i64: 32, 16>}, {transform_indices = @transform_2, window_bounds = array<i64: 1, 16>}, {transform_indices = @transform_3, window_bounds = array<i64: 16, 16>}]} {
    %c0 = arith.constant 0 : index
    %c0_0 = arith.constant 0 : index
    %0 = vector.load %arg2[%c0, %c0_0] : memref<16x32xf32, #tpu.memory_space<vmem>>, vector<16x32xf32>
    %c0_1 = arith.constant 0 : index
    %c0_2 = arith.constant 0 : index
    %1 = vector.load %arg3[%c0_1, %c0_2] : memref<32x16xf32, #tpu.memory_space<vmem>>, vector<32x16xf32>
    %cst = arith.constant dense<0.000000e+00> : vector<16x16xf32>
    %2 = tpu.matmul %0, %1, %cst {dimension_numbers = #tpu.dot_dimension_numbers<[1], [0], [0], [1], [0, 0, 1, 1], [], []>} : vector<16x32xf32>, vector<32x16xf32>, vector<16x16xf32> -> vector<16x16xf32>
    %c0_3 = arith.constant 0 : index
    %c0_4 = arith.constant 0 : index
    %3 = vector.load %arg4[%c0_3, %c0_4] : memref<1x16xf32, #tpu.memory_space<vmem>>, vector<1x16xf32>
    %4 = vector.broadcast %3 : vector<1x16xf32> to vector<16x16xf32>
    %5 = arith.addf %2, %4 : vector<16x16xf32>
    %c0_5 = arith.constant 0 : index
    %c0_6 = arith.constant 0 : index
    %6 = vector.load %arg5[%c0_5, %c0_6] : memref<16x16xf32, #tpu.memory_space<vmem>>, vector<16x16xf32>
    tpu.vector_store %arg5[%c0_5, %c0_6], %5 {strides = array<i32>} : memref<16x16xf32, #tpu.memory_space<vmem>>, vector<16x16xf32>,
    return
  }
  func.func @transform_0(%arg0: i32, %arg1: i32) -> (i32, i32) {
    %c0_i32 = arith.constant 0 : i32
    %c0_i32_0 = arith.constant 0 : i32
    return %arg0, %c0_i32 : i32, i32
  }
  func.func @transform_1(%arg0: i32, %arg1: i32) -> (i32, i32) {
    %c0_i32 = arith.constant 0 : i32
    %c0_i32_0 = arith.constant 0 : i32
    return %c0_i32, %arg1 : i32, i32
  }
  func.func @transform_2(%arg0: i32, %arg1: i32) -> (i32, i32) {
    %c0_i32 = arith.constant 0 : i32
    %c0_i32_0 = arith.constant 0 : i32
    return %c0_i32, %arg1 : i32, i32
  }
  func.func @transform_3(%arg0: i32, %arg1: i32) -> (i32, i32) {
    %c0_i32 = arith.constant 0 : i32
    return %arg0, %arg1 : i32, i32
  }
}

</mosaic_0001>

<bundles_post_ra>
// kernel: tpu_custom_call.1
= control target key start
LH: loop header
LB: loop body
LE: loop exit
PB: predicated region body
PF: predicated region fallthrough
CT: control target
= control target key end

     0   :  { %vm28_vm0 = vcmask 261120   ;;  %s221_s0 = inlined_call_operand.vmem [shape: f32[16,32], index: 0, kind: input, shape index: {}]   ;;  %s222_s1 = inlined_call_operand.vmem [shape: f32[32,16], index: 1, kind: input, shape index: {}]   ;;  %s223_s2 = inlined_call_operand.vmem [shape: f32[1,16], index: 2, kind: input, shape index: {}]   ;;  %s224_s3 = inlined_call_operand.hbm [shape: f32[16,16], index: 3, kind: output, shape index: {}]  }
   0x1   :  { %v20_v0 = vld [vmem:[%s222_s1 + $0x18] sm:$0xff]  ;;  %v19_v1 = vld [vmem:[%s222_s1 + $0x10] sm:$0xff]  ;;  %v15_v2 = vld [vmem:[%s221_s0] sm:$0xff] }
   0x2   :  { %138 = vmatprep.subr.mxu0 %v20_v0  ;;  %v18_v3 = vld [vmem:[%s222_s1 + $0x8] sm:$0xff]  ;;  %146 = vmatprep.mubr.msk.f32.mxu0 %vm28_vm0, %v15_v2 }
   0x3   :  { %139 = vmatpush3.msra.mxu0 %v20_v0 }
   0x4   :  { %8 = vsyncpa [#allocation3], 0  ;;  %140 = vmatprep.subr.mxu0 %v19_v1  ;;  %v17_v4 = vld [vmem:[%s222_s1] sm:$0xff]  ;;  %v16_v5 = vld [vmem:[%s221_s0 + $0x8] sm:$0xff]  ;;  %s174_s26 = smov [#allocation2]   ;;  %vm110_vm1 = vcmask 130048  }
   0x5   :  { %141 = vmatpush3.msra.mxu0 %v19_v1  ;;  %v129_v6 = vld [vmem:[%s223_s2] ss:$0 sm:$0xff]  ;;  %s118_s27 = sshll.u32 %s174_s26, 4  ;;  %s119_s27 = int_to_ptr.vmem [resolvable:$true] %s118_s27 }
   0x6   :  { %142 = vmatprep.subr.mxu0 %v18_v3  ;;  %s152_s1 = scalar_lea.vmem %s119_s27, 256  ;;  %p157_p1 = scmp.lt.s32.totalorder %s119_s27, %s119_s27 }
   0x7   :  { %143 = vmatpush3.msra.mxu0 %v18_v3  ;;  %p153_p0 = scmp.ne.s32.totalorder %s119_s27, %s152_s1  ;;  %p158_p2 = scmp.lt.s32.totalorder %s152_s1, %s152_s1 }
   0x8   :  { %144 = vmatprep.subr.mxu0 %v17_v4 }
   0x9   :  { %145 = vmatpush3.msra.mxu0 %v17_v4  ;;  %p159_p3 = por %p158_p2, %p157_p1 }
   0xa   :  { %147 = vmatmul.mubr.msk.f32.vlgmr.msra.gmra.mxu0 %vm28_vm0, %v16_v5 }
   0xb   :  { %p160_p4 = pnand %p159_p3, %p153_p0 }
  0xca   :  { %v148_v7 = vpop.f32.mrf.mxu0 }
  0xcb   :  { %v107_v8 = vadd.f32 %v148_v7, %v129_v6 }
  0xcc   :  { %v101_v9 = vpop.f32.mrf.mxu0 }
  0xcd   :  { %112 = vst.msk [vmem:[#allocation2 + $0x8] sm:$0xff] %vm110_vm1, %v107_v8  ;;  %v102_v10 = vadd.f32 %v129_v6, %v101_v9 }
  0xcf   :  { %111 = vst.msk [vmem:[#allocation2] sm:$0xff] %vm110_vm1, %v102_v10 }
  0xd0   :  { %163 = shalt.err (!%p160_p4)
}
  0xd1   :  { %s175_s0 = smov 128   ;;  %s176_s28 = smov 8  }
  0xd2   :  { %124 = dma.vmem_to_hbm [thread:$0]  %s119_s27, 256, %s224_s3, [#allocation3], %s175_s0, %s175_s0, %s176_s28  }
  0xd3   :  { %172 = dma.done.wait [#allocation3], 256  }
  0xd4   :  { %173 = vsyncadd [#allocation3], 4294967040 }
  0xd5   :  { %128 = vsyncpa [#allocation3], 1 }

</bundles_post_ra>
